<compile_context>
chip_gen: v7x
topology: tpu7x:2x2x1
jax: 0.10.0
libtpu: 0.0.40
codegen_flags: <defaults>
</compile_context>

<pallas_src>
import math
import functools

import jax
import jax.numpy as jnp
from jax.experimental import pallas as pl
from jax.experimental.pallas import tpu as pltpu


def _round_up(v, m):
    return ((v + m - 1) // m) * m


def _vmem_capacity_bytes():
    try:
        return int(pltpu.get_tpu_info().vmem_capacity_bytes)
    except Exception:
        return 64 << 20     # conservative default (v7x per-TC VMEM)


_VMEM_CAP = _vmem_capacity_bytes()


def _pick_tiles(N, B, vmem_cap):
    """Choose (N_p, bm, bk): padded N, output-row tile, contraction tile."""
    N128 = _round_up(N, 128)
    big_vmem = vmem_cap >= (96 << 20)   # v5e/v6e (128 MiB) vs v7x-class (64 MiB)
    bm_t = 512 if big_vmem else 256     # smaller row tile on v7x -> more
    bk_t = 512                          # parallel i-tiles to feed its 2 TCs
    if N128 <= bk_t:
        # Whole (padded) N fits one contraction tile.
        N_p = N128
        bk = N_p
        bm = min(bm_t, N_p)
        if N_p % bm != 0:
            bm = 128
    else:
        # Round N up to the target tile so we never fall back to 128-wide
        # tiles (zero padding keeps the math exact).
        N_p = _round_up(N, bk_t)
        bm, bk = bm_t, bk_t
    # v7x megacore: keep the "parallel" extent even where possible.
    if (B * (N_p // bm)) % 2 == 1 and bm % 256 == 0:
        bm //= 2
    return N_p, bm, bk


# ----------------------------------------------------------------------------
# Kernels
# ----------------------------------------------------------------------------
def _gcn_reassoc_kernel(x_ref, adj_ref, w_ref, b_ref, o_ref, acc_ref,
                        *, cdtype, bk, x_resident):
    """Grid (b, i, k): acc += adj[i,k] @ x[k,:]; finalize: o = acc @ W + bias.

    x_ref   : (N_p, F_in_p) if x_resident else (bk, F_in_p)   [input dtype]
    adj_ref : (bm, bk)                                         [input dtype]
    w_ref   : (F_in_p, F_out_p)                                [compute dtype]
    b_ref   : (1, F_out_p)  f32 (zeros if module bias=False)
    o_ref   : (bm, F_out_p) resident output tile (same block across k)
    acc_ref : (bm, F_in_p)  f32 accumulator scratch
    """
    k = pl.program_id(2)

    @pl.when(k == 0)
    def _init():
        acc_ref[...] = jnp.zeros_like(acc_ref)

    if x_resident:
        start = pl.multiple_of(k * bk, bk)
        x_blk = x_ref[pl.ds(start, bk), :]
    else:
        x_blk = x_ref[...]

    # In-kernel cast of the streamed operands (VPU cast hides under the MXU).
    acc_ref[...] += jnp.dot(adj_ref[...].astype(cdtype), x_blk.astype(cdtype),
                            preferred_element_type=jnp.float32)

    @pl.when(k == pl.num_programs(2) - 1)
    def _finalize():
        # X@W work is paid exactly once per output tile here.
        out = jnp.dot(acc_ref[...].astype(cdtype), w_ref[...],
                      preferred_element_type=jnp.float32)
        o_ref[...] = (out + b_ref[...]).astype(o_ref.dtype)


def _gcn_spmm_kernel(sup_ref, adj_ref, b_ref, o_ref, acc_ref,
                     *, cdtype, bk, sup_resident):
    """Grid (b, i, k): acc += adj[i,k] @ support[k,:]; finalize adds bias."""
    k = pl.program_id(2)

    @pl.when(k == 0)
    def _init():
        acc_ref[...] = jnp.zeros_like(acc_ref)

    if sup_resident:
        start = pl.multiple_of(k * bk, bk)
        s_blk = sup_ref[pl.ds(start, bk), :]
    else:
        s_blk = sup_ref[...]

    acc_ref[...] += jnp.dot(adj_ref[...].astype(cdtype), s_blk.astype(cdtype),
                            preferred_element_type=jnp.float32)

    @pl.when(k == pl.num_programs(2) - 1)
    def _finalize():
        o_ref[...] = (acc_ref[...] + b_ref[...]).astype(o_ref.dtype)


def _project_kernel(x_ref, w_ref, o_ref, *, cdtype):
    """support tile = x tile @ W  (f32 accumulation, stored in compute dtype)."""
    o_ref[...] = jnp.dot(x_ref[...].astype(cdtype), w_ref[...],
                         preferred_element_type=jnp.float32).astype(o_ref.dtype)


# ----------------------------------------------------------------------------
# Wrapper
# ----------------------------------------------------------------------------
@functools.partial(jax.jit, static_argnames=("compute_dtype",))
def graph_convolution(x, adj, weight, bias=None, *, compute_dtype=jnp.bfloat16):
    """Pallas TPU implementation of GraphConvolution.forward.

    x:      [B, N, F_in]
    adj:    [B, N, N]
    weight: [F_in, F_out]
    bias:   [1, 1, F_out] or None
    compute_dtype: MXU operand dtype (default bfloat16; accumulation is f32).
    returns [B, N, F_out] in x.dtype
    """
    B, N, F_in = x.shape
    F_in_w, F_out = weight.shape
    assert F_in_w == F_in, "weight in_features mismatch"
    assert adj.shape == (B, N, N), "adj must be [B, N, N]"

    out_dtype = x.dtype
    cdtype = (jnp.dtype(compute_dtype) if compute_dtype is not None
              else jnp.dtype(x.dtype))

    F_in_p = _round_up(F_in, 128)
    F_out_p = _round_up(F_out, 128)           # lane-dense output stores
    N_p, bm, bk = _pick_tiles(N, B, _VMEM_CAP)

    adj_i = jnp.dtype(adj.dtype).itemsize
    x_i = jnp.dtype(x.dtype).itemsize
    ci = jnp.dtype(cdtype).itemsize
    oi = jnp.dtype(out_dtype).itemsize

    # Pad only when required; keep adj / x in their input dtype (in-kernel cast).
    adj_p = adj if N_p == N else jnp.pad(adj, ((0, 0), (0, N_p - N), (0, N_p - N)))
    if (N_p, F_in_p) == (N, F_in):
        x_p = x
    else:
        x_p = jnp.pad(x, ((0, 0), (0, N_p - N), (0, F_in_p - F_in)))

    w_p = jnp.pad(weight.astype(cdtype),
                  ((0, F_in_p - F_in), (0, F_out_p - F_out)))
    if bias is not None:
        b2 = jnp.pad(bias.reshape(1, F_out).astype(jnp.float32),
                     ((0, 0), (0, F_out_p - F_out)))
    else:
        b2 = jnp.zeros((1, F_out_p), jnp.float32)

    grid = (B, N_p // bm, N_p // bk)
    adj_spec = pl.BlockSpec((None, bm, bk), lambda b, i, k: (b, i, k))
    b_spec = pl.BlockSpec((1, F_out_p), lambda b, i, k: (0, 0))
    o_spec = pl.BlockSpec((None, bm, F_out_p), lambda b, i, k: (b, i, 0))

    vmem_cap_lim = int(0.85 * _VMEM_CAP)      # ~54 MiB on v7x, ~109 MiB v5e/v6e

    if F_in_p <= F_out_p:
        # ------------------ (adj @ x) @ W (reassociated) ---------------------
        x_resident = N_p * F_in_p * x_i <= (4 << 20)
        if x_resident:
            x_spec = pl.BlockSpec((None, N_p, F_in_p), lambda b, i, k: (b, 0, 0))
        else:
            x_spec = pl.BlockSpec((None, bk, F_in_p), lambda b, i, k: (b, k, 0))
        w_spec = pl.BlockSpec((F_in_p, F_out_p), lambda b, i, k: (0, 0))

        flops = 2 * B * N_p * N_p * F_in_p + 2 * B * N_p * F_in_p * F_out_p
        x_reads = 1 if x_resident else (N_p // bm)
        bytes_accessed = (B * N_p * N_p * adj_i
                          + x_reads * B * N_p * F_in_p * x_i
                          + F_in_p * F_out_p * ci + F_out_p * 4
                          + B * N_p * F_out_p * oi)

        vmem_est = (2 * bm * bk * adj_i                                  # adj tiles
                    + (2 * N_p * F_in_p * x_i if x_resident
                       else 2 * bk * F_in_p * x_i)                       # x
                    + 2 * F_in_p * F_out_p * ci                          # weight
                    + 2 * 8 * F_out_p * 4                                # bias
                    + 2 * bm * F_out_p * oi                              # output
                    + bm * F_in_p * 4                                    # f32 acc
                    + bm * bk * ci + bk * F_in_p * ci                    # cast temps
                    + bm * F_out_p * 4)                                  # finalize temp
        vmem_limit = max(min(int(1.3 * vmem_est) + (4 << 20), vmem_cap_lim),
                         16 << 20)

        kernel = functools.partial(_gcn_reassoc_kernel, cdtype=cdtype, bk=bk,
                                   x_resident=x_resident)
        out_p = pl.pallas_call(
            kernel,
            out_shape=jax.ShapeDtypeStruct((B, N_p, F_out_p), out_dtype),
            grid_spec=pltpu.PrefetchScalarGridSpec(
                num_scalar_prefetch=0,
                grid=grid,
                in_specs=[x_spec, adj_spec, w_spec, b_spec],
                out_specs=o_spec,
                scratch_shapes=[pltpu.VMEM((bm, F_in_p), jnp.float32)],
            ),
            compiler_params=pltpu.CompilerParams(
                dimension_semantics=("parallel", "parallel", "arbitrary"),
                vmem_limit_bytes=int(vmem_limit),
            ),
            cost_estimate=pl.CostEstimate(flops=int(flops), transcendentals=0,
                                          bytes_accessed=int(bytes_accessed)),
        )(x_p, adj_p, w_p, b2)
    else:
        # --------- support = X @ W once, then adj @ support ------------------
        proj_vmem = (2 * bm * F_in_p * x_i + 2 * F_in_p * F_out_p * ci
                     + 2 * bm * F_out_p * ci + bm * F_in_p * ci
                     + bm * F_out_p * 4)
        proj_limit = max(min(int(1.3 * proj_vmem) + (4 << 20), vmem_cap_lim),
                         16 << 20)
        support = pl.pallas_call(
            functools.partial(_project_kernel, cdtype=cdtype),
            out_shape=jax.ShapeDtypeStruct((B, N_p, F_out_p), cdtype),
            grid_spec=pltpu.PrefetchScalarGridSpec(
                num_scalar_prefetch=0,
                grid=(B, N_p // bm),
                in_specs=[pl.BlockSpec((None, bm, F_in_p), lambda b, i: (b, i, 0)),
                          pl.BlockSpec((F_in_p, F_out_p), lambda b, i: (0, 0))],
                out_specs=pl.BlockSpec((None, bm, F_out_p), lambda b, i: (b, i, 0)),
            ),
            compiler_params=pltpu.CompilerParams(
                dimension_semantics=("parallel", "parallel"),
                vmem_limit_bytes=int(proj_limit),
            ),
            cost_estimate=pl.CostEstimate(
                flops=int(2 * B * N_p * F_in_p * F_out_p), transcendentals=0,
                bytes_accessed=int(B * N_p * F_in_p * x_i
                                   + F_in_p * F_out_p * ci
                                   + B * N_p * F_out_p * ci)),
        )(x_p, w_p)

        sup_resident = N_p * F_out_p * ci <= (4 << 20)
        if sup_resident:
            s_spec = pl.BlockSpec((None, N_p, F_out_p), lambda b, i, k: (b, 0, 0))
        else:
            s_spec = pl.BlockSpec((None, bk, F_out_p), lambda b, i, k: (b, k, 0))

        flops = 2 * B * N_p * N_p * F_out_p
        s_reads = 1 if sup_resident else (N_p // bm)
        bytes_accessed = (B * N_p * N_p * adj_i
                          + s_reads * B * N_p * F_out_p * ci
                          + F_out_p * 4 + B * N_p * F_out_p * oi)
        vmem_est = (2 * bm * bk * adj_i
                    + (2 * N_p * F_out_p * ci if sup_resident
                       else 2 * bk * F_out_p * ci)
                    + 2 * 8 * F_out_p * 4
                    + 2 * bm * F_out_p * oi
                    + bm * F_out_p * 4
                    + bm * bk * ci)
        vmem_limit = max(min(int(1.3 * vmem_est) + (4 << 20), vmem_cap_lim),
                         16 << 20)

        kernel = functools.partial(_gcn_spmm_kernel, cdtype=cdtype, bk=bk,
                                   sup_resident=sup_resident)
        out_p = pl.pallas_call(
            kernel,
            out_shape=jax.ShapeDtypeStruct((B, N_p, F_out_p), out_dtype),
            grid_spec=pltpu.PrefetchScalarGridSpec(
                num_scalar_prefetch=0,
                grid=grid,
                in_specs=[s_spec, adj_spec, b_spec],
                out_specs=o_spec,
                scratch_shapes=[pltpu.VMEM((bm, F_out_p), jnp.float32)],
            ),
            compiler_params=pltpu.CompilerParams(
                dimension_semantics=("parallel", "parallel", "arbitrary"),
                vmem_limit_bytes=int(vmem_limit),
            ),
            cost_estimate=pl.CostEstimate(flops=int(flops), transcendentals=0,
                                          bytes_accessed=int(bytes_accessed)),
        )(support, adj_p, b2)

    return out_p[:, :N, :F_out]


def init_params(key, in_features, out_features, use_bias=False):
    """Deterministic init matching reset_parameters(): U(-stdv, stdv), stdv=1/sqrt(out)."""
    stdv = 1.0 / math.sqrt(out_features)
    kw, kb = jax.random.split(key)
    weight = jax.random.uniform(kw, (in_features, out_features),
                                dtype=jnp.float32, minval=-stdv, maxval=stdv)
    bias = None
    if use_bias:
        bias = jax.random.uniform(kb, (1, 1, out_features),
                                  dtype=jnp.float32, minval=-stdv, maxval=stdv)
    return weight, bias


if __name__ == "__main__":
    key = jax.random.PRNGKey(0)
    k_x, k_adj, k_p, k_x2, k_adj2, k_p2 = jax.random.split(key, 6)

    # --- Case 1: square layer -> reassociated (adj @ x) @ W path -------------
    B, N, F_in, F_out = 2, 16, 32, 32
    x = jax.random.normal(k_x, (B, N, F_in), dtype=jnp.float32)
    adj = jax.random.normal(k_adj, (B, N, N), dtype=jnp.float32)

    weight, _ = init_params(k_p, F_in, F_out, use_bias=False)
    ref = jnp.matmul(adj, jnp.matmul(x, weight))

    # f32 compute path (exact-ish check).
    out_f32 = jax.block_until_ready(
        graph_convolution(x, adj, weight, None, compute_dtype=jnp.float32))
    assert out_f32.shape == (B, N, F_out)
    assert jnp.allclose(out_f32, ref, atol=1e-4, rtol=1e-4)

    # Default bf16 MXU-operand path (f32 accumulation) — loose check.
    out_bf16 = jax.block_until_ready(graph_convolution(x, adj, weight, None))
    assert out_bf16.shape == (B, N, F_out)
    assert jnp.allclose(out_bf16, ref, atol=1e-1, rtol=1e-1)

    # Bias path.
    weight_b, bias_b = init_params(k_p, F_in, F_out, use_bias=True)
    ref_b = jnp.matmul(adj, jnp.matmul(x, weight_b)) + bias_b
    out_b = jax.block_until_ready(
        graph_convolution(x, adj, weight_b, bias_b, compute_dtype=jnp.float32))
    assert jnp.allclose(out_b, ref_b, atol=1e-4, rtol=1e-4)

    # --- Case 2: F_in >> F_out -> precomputed support + adj @ support path ---
    B2, N2, F_in2, F_out2 = 1, 20, 256, 32
    x2 = jax.random.normal(k_x2, (B2, N2, F_in2), dtype=jnp.float32)
    adj2 = jax.random.normal(k_adj2, (B2, N2, N2), dtype=jnp.float32)
    weight2, _ = init_params(k_p2, F_in2, F_out2, use_bias=False)
    ref2 = jnp.matmul(adj2, jnp.matmul(x2, weight2))
    out2 = jax.block_until_ready(
        graph_convolution(x2, adj2, weight2, None, compute_dtype=jnp.float32))
    assert out2.shape == (B2, N2, F_out2)
    assert jnp.allclose(out2, ref2, atol=1e-4, rtol=1e-4)

    print("KERNEL_OK")
</pallas_src>

<mosaic_0001>
module attributes {stable_mosaic.version = 11 : i64} {
  func.func @_gcn_reassoc_kernel(%arg0: i32, %arg1: i32, %arg2: i32, %arg3: memref<1x128x128xf32, #tpu.memory_space<vmem>>, %arg4: memref<1x128x128xf32, #tpu.memory_space<vmem>>, %arg5: memref<128x128xf32, #tpu.memory_space<vmem>>, %arg6: memref<1x128xf32, #tpu.memory_space<vmem>>, %arg7: memref<1x128x128xf32, #tpu.memory_space<vmem>>, %arg8: memref<128x128xf32, #tpu.memory_space<vmem>>) attributes {dimension_semantics = [#tpu.dimension_semantics<parallel>, #tpu.dimension_semantics<parallel>, #tpu.dimension_semantics<arbitrary>], iteration_bounds = array<i64: 2, 1, 1>, scalar_prefetch = 0 : i64, scratch_operands = 1 : i64, tpu.core_type = #tpu.core_type<tc>, window_params = [{transform_indices = @transform_0, window_bounds = array<i64: 1, 128, 128>}, {transform_indices = @transform_1, window_bounds = array<i64: 1, 128, 128>}, {pipeline_mode = #tpu.pipeline_mode<synchronous>, transform_indices = @transform_2, window_bounds = array<i64: 128, 128>}, {pipeline_mode = #tpu.pipeline_mode<synchronous>, transform_indices = @transform_3, window_bounds = array<i64: 1, 128>}, {transform_indices = @transform_4, window_bounds = array<i64: 1, 128, 128>}]} {
    %c0_i32 = arith.constant 0 : i32
    %0 = arith.cmpi eq, %arg2, %c0_i32 : i32
    %1 = arith.extui %0 : i1 to i32
    %c0_i32_0 = arith.constant 0 : i32
    %2 = arith.cmpi ne, %1, %c0_i32_0 : i32
    scf.if %2 {
      %cst_11 = arith.constant 0.000000e+00 : f32
      %17 = vector.broadcast %cst_11 : f32 to vector<128x128xf32>
      %c0_12 = arith.constant 0 : index
      %c0_13 = arith.constant 0 : index
      %18 = vector.load %arg8[%c0_12, %c0_13] : memref<128x128xf32, #tpu.memory_space<vmem>>, vector<128x128xf32>
      tpu.vector_store %arg8[%c0_12, %c0_13], %17 {strides = array<i32>} : memref<128x128xf32, #tpu.memory_space<vmem>>, vector<128x128xf32>,
    } else {
    }
    %c128_i32 = arith.constant 128 : i32
    %3 = arith.muli %arg2, %c128_i32 : i32
    %4 = tpu.assume_multiple %3, 128 : i32
    %c0 = arith.constant 0 : index
    %5 = arith.index_cast %4 : i32 to index
    %c0_1 = arith.constant 0 : index
    %6 = vector.load %arg3[%c0, %5, %c0_1] : memref<1x128x128xf32, #tpu.memory_space<vmem>>, vector<1x128x128xf32>
    %7 = vector.shape_cast %6 : vector<1x128x128xf32> to vector<128x128xf32>
    %c0_2 = arith.constant 0 : index
    %c0_3 = arith.constant 0 : index
    %8 = vector.load %arg8[%c0_2, %c0_3] : memref<128x128xf32, #tpu.memory_space<vmem>>, vector<128x128xf32>
    %c0_4 = arith.constant 0 : index
    %c0_5 = arith.constant 0 : index
    %c0_6 = arith.constant 0 : index
    %9 = vector.load %arg4[%c0_4, %c0_5, %c0_6] : memref<1x128x128xf32, #tpu.memory_space<vmem>>, vector<1x128x128xf32>
    %10 = vector.shape_cast %9 : vector<1x128x128xf32> to vector<128x128xf32>
    %cst = arith.constant dense<0.000000e+00> : vector<128x128xf32>
    %11 = tpu.matmul %10, %7, %cst {dimension_numbers = #tpu.dot_dimension_numbers<[1], [0], [0], [1], [0, 0, 1, 1], [], []>} : vector<128x128xf32>, vector<128x128xf32>, vector<128x128xf32> -> vector<128x128xf32>
    %12 = arith.addf %8, %11 : vector<128x128xf32>
    %c0_7 = arith.constant 0 : index
    %c0_8 = arith.constant 0 : index
    %13 = vector.load %arg8[%c0_7, %c0_8] : memref<128x128xf32, #tpu.memory_space<vmem>>, vector<128x128xf32>
    tpu.vector_store %arg8[%c0_7, %c0_8], %12 {strides = array<i32>} : memref<128x128xf32, #tpu.memory_space<vmem>>, vector<128x128xf32>,
    %c0_i32_9 = arith.constant 0 : i32
    %14 = arith.cmpi eq, %arg2, %c0_i32_9 : i32
    %15 = arith.extui %14 : i1 to i32
    %c0_i32_10 = arith.constant 0 : i32
    %16 = arith.cmpi ne, %15, %c0_i32_10 : i32
    scf.if %16 {
      %c0_11 = arith.constant 0 : index
      %c0_12 = arith.constant 0 : index
      %17 = vector.load %arg8[%c0_11, %c0_12] : memref<128x128xf32, #tpu.memory_space<vmem>>, vector<128x128xf32>
      %c0_13 = arith.constant 0 : index
      %c0_14 = arith.constant 0 : index
      %18 = vector.load %arg5[%c0_13, %c0_14] : memref<128x128xf32, #tpu.memory_space<vmem>>, vector<128x128xf32>
      %cst_15 = arith.constant dense<0.000000e+00> : vector<128x128xf32>
      %19 = tpu.matmul %17, %18, %cst_15 {dimension_numbers = #tpu.dot_dimension_numbers<[1], [0], [0], [1], [0, 0, 1, 1], [], []>} : vector<128x128xf32>, vector<128x128xf32>, vector<128x128xf32> -> vector<128x128xf32>
      %c0_16 = arith.constant 0 : index
      %c0_17 = arith.constant 0 : index
      %20 = vector.load %arg6[%c0_16, %c0_17] : memref<1x128xf32, #tpu.memory_space<vmem>>, vector<1x128xf32>
      %21 = vector.broadcast %20 : vector<1x128xf32> to vector<128x128xf32>
      %22 = arith.addf %19, %21 : vector<128x128xf32>
      %c0_18 = arith.constant 0 : index
      %c0_19 = arith.constant 0 : index
      %c0_20 = arith.constant 0 : index
      %23 = vector.load %arg7[%c0_18, %c0_19, %c0_20] : memref<1x128x128xf32, #tpu.memory_space<vmem>>, vector<1x128x128xf32>
      %24 = vector.shape_cast %23 : vector<1x128x128xf32> to vector<128x128xf32>
      %25 = vector.shape_cast %22 : vector<128x128xf32> to vector<1x128x128xf32>
      tpu.vector_store %arg7[%c0_18, %c0_19, %c0_20], %25 {strides = array<i32>} : memref<1x128x128xf32, #tpu.memory_space<vmem>>, vector<1x128x128xf32>,
    } else {
    }
    return
  }
  func.func @transform_0(%arg0: i32, %arg1: i32, %arg2: i32) -> (i32, i32, i32) {
    %c0_i32 = arith.constant 0 : i32
    %c0_i32_0 = arith.constant 0 : i32
    %c0_i32_1 = arith.constant 0 : i32
    return %arg0, %c0_i32, %c0_i32_0 : i32, i32, i32
  }
  func.func @transform_1(%arg0: i32, %arg1: i32, %arg2: i32) -> (i32, i32, i32) {
    %c0_i32 = arith.constant 0 : i32
    return %arg0, %arg1, %arg2 : i32, i32, i32
  }
  func.func @transform_2(%arg0: i32, %arg1: i32, %arg2: i32) -> (i32, i32) {
    %c0_i32 = arith.constant 0 : i32
    %c0_i32_0 = arith.constant 0 : i32
    %c0_i32_1 = arith.constant 0 : i32
    return %c0_i32, %c0_i32_0 : i32, i32
  }
  func.func @transform_3(%arg0: i32, %arg1: i32, %arg2: i32) -> (i32, i32) {
    %c0_i32 = arith.constant 0 : i32
    %c0_i32_0 = arith.constant 0 : i32
    %c0_i32_1 = arith.constant 0 : i32
    return %c0_i32, %c0_i32_0 : i32, i32
  }
  func.func @transform_4(%arg0: i32, %arg1: i32, %arg2: i32) -> (i32, i32, i32) {
    %c0_i32 = arith.constant 0 : i32
    %c0_i32_0 = arith.constant 0 : i32
    return %arg0, %arg1, %c0_i32 : i32, i32, i32
  }
}

</mosaic_0001>

<bundles_post_ra>
// kernel: graph_convolution.1
= control target key start
LH: loop header
LB: loop body
LE: loop exit
PB: predicated region body
PF: predicated region fallthrough
CT: control target
= control target key end

     0   :  { %s1162_s15 = smov 0   ;;  %s1164_s16 = smov 0   ;;  %s1308_s0 = inlined_call_operand.vmem [shape: f32[2,128,128], index: 0, kind: input, shape index: {}]   ;;  %s1309_s1 = inlined_call_operand.vmem [shape: f32[2,128,128], index: 1, kind: input, shape index: {}]   ;;  %s1310_s2 = inlined_call_operand.vmem [shape: f32[128,128], index: 2, kind: input, shape index: {}]   ;;  %s1311_s3 = inlined_call_operand.vmem [shape: f32[1,128], index: 3, kind: input, shape index: {}]   ;;  %s1312_s4 = inlined_call_operand.vmem [shape: f32[2,128,128], index: 4, kind: output, shape index: {}]  }
   0x1   :  { %s1166_s17 = smov 0  }
   0x2 LB: > { %s33_s18 = sadd.s32 1, %s1131_s16  ;;  %p836_p0 = scmp.ge.s32.totalorder %s1135_s17, 1  ;;  %s1135_s17 = sphi %s1166_s17, %s14_s17   ;;  %s1131_s16 = sphi %s1164_s16, %s1314_s16   ;;  %s1127_s15 = sphi %s1162_s15, %s1313_s15  }
   0x3   : > { %p35_p1 = scmp.ge.s32.totalorder %s33_s18, 2  ;;  %p205_p2 = scmp.lt.s32.totalorder %s1135_s17, 3 }
   0x5   : > { %s1316_s18 = smov (%p35_p1, %s33_s18), 0  ;;  %p206_p3 = pnand %p836_p0, %p205_p2 }
   0x6   : > { %p247_p4 = scmp.lt.s32.totalorder (!%p206_p3), %s1127_s15, 1  ;;  %v541_v0 = vld [vmem:[%s1310_s2] sm:$0xff] (!%p206_p3)  ;;  %v542_v1 = vld [vmem:[%s1310_s2 + $0x8] sm:$0xff] (!%p206_p3)  ;;  %v543_v2 = vld [vmem:[%s1310_s2 + $0x10] sm:$0xff] (!%p206_p3) }
   0x7   : > { %209 = sbr.rel (%p206_p3) target bundleno = 510 (0x1fe), region = 36  ;;  %v1057_v3 = vpack.c.bf16 (!%p206_p3), %v542_v1, %v541_v0  ;;  %v544_v4 = vld [vmem:[%s1310_s2 + $0x18] sm:$0xff] (!%p206_p3)  ;;  %v545_v6 = vld [vmem:[%s1310_s2 + $0x20] sm:$0xff] (!%p206_p3)  ;;  %v546_v7 = vld [vmem:[%s1310_s2 + $0x28] sm:$0xff] (!%p206_p3) }
   0x8   : > { %v1061_v5 = vpack.c.bf16 (!%p206_p3), %v544_v4, %v543_v2  ;;  %v1065_v8 = vpack.c.bf16 (!%p206_p3), %v546_v7, %v545_v6  ;;  %v547_v9 = vld [vmem:[%s1310_s2 + $0x30] sm:$0xff] (!%p206_p3)  ;;  %v548_v10 = vld [vmem:[%s1310_s2 + $0x38] sm:$0xff] (!%p206_p3)  ;;  %v549_v20 = vld [vmem:[%s1310_s2 + $0x40] sm:$0xff] (!%p206_p3) }
   0x9   : > { %1058 = vmatprep.subr.bf16.mxu1 (!%p206_p3), %v1057_v3  ;;  %v1069_v19 = vpack.c.bf16 (!%p206_p3), %v548_v10, %v547_v9  ;;  %v550_v21 = vld [vmem:[%s1310_s2 + $0x48] sm:$0xff] (!%p206_p3)  ;;  %v551_v27 = vld [vmem:[%s1310_s2 + $0x50] sm:$0xff] (!%p206_p3)  ;;  %v552_v28 = vld [vmem:[%s1310_s2 + $0x58] sm:$0xff] (!%p206_p3) }
   0xa   : > { %1060 = vmatpush3.bf16.msra.mxu1 (!%p206_p3), %v1057_v3  ;;  %v1073_v26 = vpack.c.bf16 (!%p206_p3), %v550_v21, %v549_v20  ;;  %v1077_v32 = vpack.c.bf16 (!%p206_p3), %v552_v28, %v551_v27  ;;  %v553_v33 = vld [vmem:[%s1310_s2 + $0x60] sm:$0xff] (!%p206_p3)  ;;  %v554_v34 = vld [vmem:[%s1310_s2 + $0x68] sm:$0xff] (!%p206_p3)  ;;  %v555_v39 = vld [vmem:[%s1310_s2 + $0x70] sm:$0xff] (!%p206_p3) }
   0xb   : > { %1062 = vmatprep.subr.bf16.mxu1 (!%p206_p3), %v1061_v5  ;;  %v1081_v38 = vpack.c.bf16 (!%p206_p3), %v554_v34, %v553_v33  ;;  %v556_v40 = vld [vmem:[%s1310_s2 + $0x78] sm:$0xff] (!%p206_p3) }
   0xc   : > { %v1085_v44 = vpack.c.bf16 (!%p206_p3), %v556_v40, %v555_v39 }
   0xe   : > { %s1318_s15 = smov (!%p247_p4, %s1127_s15), 1  ;;  %1064 = vmatpush3.bf16.msra.mxu1 %v1061_v5 }
   0xf   : > { %s1198_s5 = sshll.u32 %s1318_s15, 7  ;;  %1066 = vmatprep.subr.bf16.mxu1 %v1065_v8 }
  0x10   : > { %s1204_s8 = scalar_lea.vmem %s1308_s0, %s1198_s5  ;;  %s1222_s15 = scalar_lea.vmem %s1309_s1, %s1198_s5 }
  0x11   : > { %v297_v11 = vld [vmem:[%s1204_s8] sm:$0xff]  ;;  %v298_v12 = vld [vmem:[%s1204_s8 + $0x8] sm:$0xff]  ;;  %v299_v13 = vld [vmem:[%s1204_s8 + $0x10] sm:$0xff]  ;;  %s1281_s14 = scalar_lea.vmem %s1312_s4, %s1198_s5 }
  0x12   : > { %v1025_v14 = vpack.c.bf16 %v298_v12, %v297_v11  ;;  %v300_v15 = vld [vmem:[%s1204_s8 + $0x18] sm:$0xff]  ;;  %v301_v17 = vld [vmem:[%s1204_s8 + $0x20] sm:$0xff]  ;;  %v302_v18 = vld [vmem:[%s1204_s8 + $0x28] sm:$0xff]  ;;  %1068 = vmatpush3.bf16.msra.mxu1 %v1065_v8 }
  0x13   : > { %v1029_v16 = vpack.c.bf16 %v300_v15, %v299_v13  ;;  %v1033_v22 = vpack.c.bf16 %v302_v18, %v301_v17  ;;  %v329_v23 = vld [vmem:[%s1222_s15] sm:$0xff]  ;;  %v303_v24 = vld [vmem:[%s1204_s8 + $0x30] sm:$0xff]  ;;  %v304_v25 = vld [vmem:[%s1204_s8 + $0x38] sm:$0xff]  ;;  %1070 = vmatprep.subr.bf16.mxu1 %v1069_v19 }
  0x14   : > { %1026 = vmatprep.subr.bf16.mxu0 %v1025_v14  ;;  %945 = vmatprep.mubr.f32.mxu0 %v329_v23  ;;  %v1037_v29 = vpack.c.bf16 %v304_v25, %v303_v24  ;;  %v305_v30 = vld [vmem:[%s1204_s8 + $0x40] sm:$0xff]  ;;  %v306_v31 = vld [vmem:[%s1204_s8 + $0x48] sm:$0xff]  ;;  %v307_v36 = vld [vmem:[%s1204_s8 + $0x50] sm:$0xff] }
  0x15   : > { %1028 = vmatpush3.bf16.msra.mxu0 %v1025_v14  ;;  %v1041_v35 = vpack.c.bf16 %v306_v31, %v305_v30  ;;  %v308_v37 = vld [vmem:[%s1204_s8 + $0x58] sm:$0xff]  ;;  %v309_v42 = vld [vmem:[%s1204_s8 + $0x60] sm:$0xff]  ;;  %v310_v43 = vld [vmem:[%s1204_s8 + $0x68] sm:$0xff] }
  0x16   : > { %1030 = vmatprep.subr.bf16.mxu0 %v1029_v16  ;;  %1072 = vmatpush3.bf16.msra.mxu1 %v1069_v19  ;;  %v1045_v41 = vpack.c.bf16 %v308_v37, %v307_v36  ;;  %v1049_v45 = vpack.c.bf16 %v310_v43, %v309_v42  ;;  %v311_v46 = vld [vmem:[%s1204_s8 + $0x70] sm:$0xff]  ;;  %v312_v47 = vld [vmem:[%s1204_s8 + $0x78] sm:$0xff]  ;;  %v330_v49 = vld [vmem:[%s1222_s15 + $0x8] sm:$0xff] }
  0x17   : > { %1074 = vmatprep.subr.bf16.mxu1 %v1073_v26  ;;  %v1053_v48 = vpack.c.bf16 %v312_v47, %v311_v46  ;;  %v331_v50 = vld [vmem:[%s1222_s15 + $0x10] sm:$0xff]  ;;  %v332_v51 = vld [vmem:[%s1222_s15 + $0x18] sm:$0xff]  ;;  %v333_v52 = vld [vmem:[%s1222_s15 + $0x20] sm:$0xff] }
  0x18   : > { %v334_v53 = vld [vmem:[%s1222_s15 + $0x28] sm:$0xff]  ;;  %v335_v54 = vld [vmem:[%s1222_s15 + $0x30] sm:$0xff]  ;;  %v336_v55 = vld [vmem:[%s1222_s15 + $0x38] sm:$0xff] }
  0x19   : > { %1032 = vmatpush3.bf16.msra.mxu0 %v1029_v16  ;;  %v337_v56 = vld [vmem:[%s1222_s15 + $0x40] sm:$0xff]  ;;  %v338_v57 = vld [vmem:[%s1222_s15 + $0x48] sm:$0xff]  ;;  %v339_v58 = vld [vmem:[%s1222_s15 + $0x50] sm:$0xff] }
  0x1a   : > { %1034 = vmatprep.subr.bf16.mxu0 %v1033_v22  ;;  %1076 = vmatpush3.bf16.msra.mxu1 %v1073_v26  ;;  %v340_v59 = vld [vmem:[%s1222_s15 + $0x58] sm:$0xff]  ;;  %v341_v60 = vld [vmem:[%s1222_s15 + $0x60] sm:$0xff]  ;;  %v342_v61 = vld [vmem:[%s1222_s15 + $0x68] sm:$0xff] }
  0x1b   : > { %1078 = vmatprep.subr.bf16.mxu1 %v1077_v32  ;;  %v343_v62 = vld [vmem:[%s1222_s15 + $0x70] sm:$0xff]  ;;  %v344_v63 = vld [vmem:[%s1222_s15 + $0x78] sm:$0xff]  ;;  %v843_v16 = vld [vmem:[%s1311_s3] ss:$0 sm:$0xff] }
  0x1d   : > { %1036 = vmatpush3.bf16.msra.mxu0 %v1033_v22 }
  0x1e   : > { %1038 = vmatprep.subr.bf16.mxu0 %v1037_v29  ;;  %1080 = vmatpush3.bf16.msra.mxu1 %v1077_v32 }
  0x1f   : > { %1082 = vmatprep.subr.bf16.mxu1 %v1081_v38 }
  0x21   : > { %1040 = vmatpush3.bf16.msra.mxu0 %v1037_v29 }
  0x22   : > { %1042 = vmatprep.subr.bf16.mxu0 %v1041_v35  ;;  %1084 = vmatpush3.bf16.msra.mxu1 %v1081_v38 }
  0x23   : > { %1086 = vmatprep.subr.bf16.mxu1 %v1085_v44 }
  0x25   : > { %1044 = vmatpush3.bf16.msra.mxu0 %v1041_v35 }
  0x26   : > { %1046 = vmatprep.subr.bf16.mxu0 %v1045_v41  ;;  %1088 = vmatpush3.bf16.msra.mxu1 %v1085_v44 }
  0x29   : > { %1048 = vmatpush3.bf16.msra.mxu0 %v1045_v41 }
  0x2a   : > { %1050 = vmatprep.subr.bf16.mxu0 %v1049_v45 }
  0x2d   : > { %1052 = vmatpush3.bf16.msra.mxu0 %v1049_v45 }
  0x2e   : > { %1054 = vmatprep.subr.bf16.mxu0 %v1053_v48 }
  0x31   : > { %1056 = vmatpush3.bf16.msra.mxu0 %v1053_v48 }
  0x34   : > { %946 = vmatmul.mubr.f32.vlgmr.msra.gmra.mrb[0].mxu0 %v330_v49 }
  0x35   : > { %948 = vmatprep.mubr.f32.mxu0 %v331_v50 }
  0x38   : > { %949 = vmatmul.mubr.f32.gmra.mrb[2].mxu0 %v332_v51 }
  0x39   : > { %951 = vmatprep.mubr.f32.mxu0 %v333_v52 }
  0x3c   : > { %952 = vmatmul.mubr.f32.gmra.mrb[4].mxu0 %v334_v53 }
  0x3d   : > { %954 = vmatprep.mubr.f32.mxu0 %v335_v54 }
  0x40   : > { %955 = vmatmul.mubr.f32.gmra.mrb[6].mxu0 %v336_v55 }
  0x41   : > { %957 = vmatprep.mubr.f32.mxu0 %v337_v56 }
  0x44   : > { %958 = vmatmul.mubr.f32.gmra.mrb[8].mxu0 %v338_v57 }
  0x45   : > { %960 = vmatprep.mubr.f32.mxu0 %v339_v58 }
  0x48   : > { %961 = vmatmul.mubr.f32.gmra.mrb[10].mxu0 %v340_v59 }
  0x49   : > { %963 = vmatprep.mubr.f32.mxu0 %v341_v60 }
  0x4c   : > { %964 = vmatmul.mubr.f32.gmra.mrb[12].mxu0 %v342_v61 }
  0x4d   : > { %966 = vmatprep.mubr.f32.mxu0 %v343_v62 }
  0x50   : > { %967 = vmatmul.mubr.f32.gmra.mrb[14].mxu0 %v344_v63 }
 0x107   : > { %v947_v0 = vpop.f32.mrb[0].mxu0 }
 0x108   : > { %v411_v1 = vpop.f32.mrb[1].mxu0 }
 0x109   : > { %1001 = vmatprep.mubr.f32.mxu1 %v411_v1 }
 0x10a   : > { %1002 = vmatmul.mubr.f32.vlgmr.msra.gmra.mrb[0].mxu1 %v947_v0 }
 0x10b   : > { %v950_v2 = vpop.f32.mrb[2].mxu0 }
 0x10c   : > { %v421_v3 = vpop.f32.mrb[3].mxu0 }
 0x10d   : > { %1004 = vmatprep.mubr.f32.mxu1 %v421_v3 }
 0x10e   : > { %1005 = vmatmul.mubr.f32.gmra.mrb[2].mxu1 %v950_v2 }
 0x10f   : > { %v953_v4 = vpop.f32.mrb[4].mxu0 }
 0x110   : > { %v431_v5 = vpop.f32.mrb[5].mxu0 }
 0x111   : > { %1007 = vmatprep.mubr.f32.mxu1 %v431_v5 }
 0x112   : > { %1008 = vmatmul.mubr.f32.gmra.mrb[4].mxu1 %v953_v4 }
 0x113   : > { %v956_v6 = vpop.f32.mrb[6].mxu0 }
 0x114   : > { %v441_v7 = vpop.f32.mrb[7].mxu0 }
 0x115   : > { %1010 = vmatprep.mubr.f32.mxu1 %v441_v7 }
 0x116   : > { %1011 = vmatmul.mubr.f32.gmra.mrb[6].mxu1 %v956_v6 }
 0x117   : > { %v959_v8 = vpop.f32.mrb[8].mxu0 }
 0x118   : > { %v451_v9 = vpop.f32.mrb[9].mxu0 }
 0x119   : > { %1013 = vmatprep.mubr.f32.mxu1 %v451_v9 }
 0x11a   : > { %1014 = vmatmul.mubr.f32.gmra.mrb[8].mxu1 %v959_v8 }
 0x11b   : > { %v962_v10 = vpop.f32.mrb[10].mxu0 }
 0x11c   : > { %v461_v11 = vpop.f32.mrb[11].mxu0 }
 0x11d   : > { %1016 = vmatprep.mubr.f32.mxu1 %v461_v11 }
 0x11e   : > { %1017 = vmatmul.mubr.f32.gmra.mrb[10].mxu1 %v962_v10 }
 0x11f   : > { %v965_v12 = vpop.f32.mrb[12].mxu0 }
 0x120   : > { %v471_v13 = vpop.f32.mrb[13].mxu0 }
 0x121   : > { %1019 = vmatprep.mubr.f32.mxu1 %v471_v13 }
 0x122   : > { %1020 = vmatmul.mubr.f32.gmra.mrb[12].mxu1 %v965_v12 }
 0x123   : > { %v968_v14 = vpop.f32.mrb[14].mxu0 }
 0x124   : > { %v481_v15 = vpop.f32.mrb[15].mxu0 }
 0x125   : > { %1022 = vmatprep.mubr.f32.mxu1 %v481_v15 }
 0x126   : > { %1023 = vmatmul.mubr.f32.gmra.mrb[14].mxu1 %v968_v14 }
 0x1dd   : > { %v1003_v17 = vpop.f32.mrb[0].mxu1 }
 0x1de   : > { %v636_v18 = vadd.f32 %v1003_v17, %v843_v16  ;;  %v630_v19 = vpop.f32.mrb[1].mxu1 }
 0x1df   : > { %v631_v20 = vadd.f32 %v843_v16, %v630_v19 }
 0x1e0   : > { %710 = vst [vmem:[%s1281_s14 + $0x8] sm:$0xff] %v636_v18 }
 0x1e1   : > { %709 = vst [vmem:[%s1281_s14] sm:$0xff] %v631_v20  ;;  %v1006_v21 = vpop.f32.mrb[2].mxu1 }
 0x1e2   : > { %v646_v22 = vadd.f32 %v1006_v21, %v843_v16  ;;  %v640_v23 = vpop.f32.mrb[3].mxu1 }
 0x1e3   : > { %v641_v24 = vadd.f32 %v843_v16, %v640_v23 }
 0x1e4   : > { %712 = vst [vmem:[%s1281_s14 + $0x18] sm:$0xff] %v646_v22 }
 0x1e5   : > { %711 = vst [vmem:[%s1281_s14 + $0x10] sm:$0xff] %v641_v24  ;;  %v1009_v25 = vpop.f32.mrb[4].mxu1 }
 0x1e6   : > { %v656_v26 = vadd.f32 %v1009_v25, %v843_v16  ;;  %v650_v27 = vpop.f32.mrb[5].mxu1 }
 0x1e7   : > { %v651_v28 = vadd.f32 %v843_v16, %v650_v27 }
 0x1e8   : > { %714 = vst [vmem:[%s1281_s14 + $0x28] sm:$0xff] %v656_v26 }
 0x1e9   : > { %713 = vst [vmem:[%s1281_s14 + $0x20] sm:$0xff] %v651_v28  ;;  %v1012_v29 = vpop.f32.mrb[6].mxu1 }
 0x1ea   : > { %v666_v30 = vadd.f32 %v1012_v29, %v843_v16  ;;  %v660_v31 = vpop.f32.mrb[7].mxu1 }
 0x1eb   : > { %v661_v32 = vadd.f32 %v843_v16, %v660_v31 }
 0x1ec   : > { %716 = vst [vmem:[%s1281_s14 + $0x38] sm:$0xff] %v666_v30 }
 0x1ed   : > { %715 = vst [vmem:[%s1281_s14 + $0x30] sm:$0xff] %v661_v32  ;;  %v1015_v33 = vpop.f32.mrb[8].mxu1 }
 0x1ee   : > { %v676_v34 = vadd.f32 %v1015_v33, %v843_v16  ;;  %v670_v35 = vpop.f32.mrb[9].mxu1 }
 0x1ef   : > { %v671_v36 = vadd.f32 %v843_v16, %v670_v35 }
 0x1f0   : > { %718 = vst [vmem:[%s1281_s14 + $0x48] sm:$0xff] %v676_v34 }
 0x1f1   : > { %717 = vst [vmem:[%s1281_s14 + $0x40] sm:$0xff] %v671_v36  ;;  %v1018_v37 = vpop.f32.mrb[10].mxu1 }
 0x1f2   : > { %v686_v38 = vadd.f32 %v1018_v37, %v843_v16  ;;  %v680_v39 = vpop.f32.mrb[11].mxu1 }
 0x1f3   : > { %v681_v40 = vadd.f32 %v843_v16, %v680_v39 }
 0x1f4   : > { %720 = vst [vmem:[%s1281_s14 + $0x58] sm:$0xff] %v686_v38 }
 0x1f5   : > { %719 = vst [vmem:[%s1281_s14 + $0x50] sm:$0xff] %v681_v40  ;;  %v1021_v41 = vpop.f32.mrb[12].mxu1 }
 0x1f6   : > { %v696_v42 = vadd.f32 %v1021_v41, %v843_v16  ;;  %v690_v43 = vpop.f32.mrb[13].mxu1 }
 0x1f7   : > { %v691_v44 = vadd.f32 %v843_v16, %v690_v43 }
 0x1f8   : > { %722 = vst [vmem:[%s1281_s14 + $0x68] sm:$0xff] %v696_v42 }
 0x1f9   : > { %721 = vst [vmem:[%s1281_s14 + $0x60] sm:$0xff] %v691_v44  ;;  %v1024_v45 = vpop.f32.mrb[14].mxu1 }
 0x1fa   : > { %v706_v46 = vadd.f32 %v1024_v45, %v843_v16  ;;  %v700_v47 = vpop.f32.mrb[15].mxu1 }
 0x1fb   : > { %v701_v48 = vadd.f32 %v843_v16, %v700_v47 }
 0x1fc   : > { %724 = vst [vmem:[%s1281_s14 + $0x78] sm:$0xff] %v706_v46 }
 0x1fd   : > { %723 = vst [vmem:[%s1281_s14 + $0x70] sm:$0xff] %v701_v48 }
 0x1fe PF: > { %s14_s17 = sadd.s32 1, %s1135_s17   ;;  %s1313_s15 = smov %s1131_s16 }
 0x1ff   : > { %p11_p5 = scmp.ge.s32.totalorder %s14_s17, 4   ;;  %s1314_s16 = smov %s1316_s18 }
 0x201   :  { %13 = sbr.rel (!%p11_p5) target bundleno = 2 (0x2), region = 78 }

</bundles_post_ra>
